<compile_context>
chip_gen: v7x
topology: tpu7x:2x2x1
jax: 0.10.0
libtpu: 0.0.40
codegen_flags: <defaults>
</compile_context>

<pallas_src>
import jax
import jax.numpy as jnp
from jax.experimental import pallas as pl
from jax.experimental.pallas import tpu as pltpu

HIDDEN_SIZE = 16
INPUT_SIZE = 16
NUM_CLASSES = 2
GATE_STRIDE = 128   # each gate owns one full 128-lane block -> lane-0-aligned slices
N_GATES = 3         # z (update), r (reset), n (memory)


def _gru_cell(x, h, wx, bx, wh, bnh):
    """One GRU step.
    x:(B,IN) h:(B,H); wx:(IN,3*GS) bx:(1,3*GS) wh:(H,3*GS) bnh:(1,GS)."""
    GS = GATE_STRIDE
    H = HIDDEN_SIZE
    # Two fused MXU calls replace the six per-gate matmuls.
    xw = jnp.dot(x, wx, preferred_element_type=jnp.float32) + bx   # (B, 3*GS)
    hw = jnp.dot(h, wh, preferred_element_type=jnp.float32)        # (B, 3*GS)
    # Every slice below starts at lane 0 or a multiple of 128 -> no lane rotations.
    z = jax.nn.sigmoid(xw[:, 0:GS] + hw[:, 0:GS])[:, :H]                      # update gate
    r = jax.nn.sigmoid(xw[:, GS:2 * GS] + hw[:, GS:2 * GS])                   # reset gate
    n = jnp.tanh(xw[:, 2 * GS:3 * GS] + r * (hw[:, 2 * GS:3 * GS] + bnh))[:, :H]
    return z * h + (1.0 - z) * n


def gru_seq_kernel(x_ref, h0_ref, wx_ref, bx_ref, wh_ref, bnh_ref, wc_ref, bc_ref,
                   h_seq_ref, y_ref, h_carry):
    t = pl.program_id(0)

    @pl.when(t == 0)
    def _init():
        h_carry[...] = h0_ref[...]

    h_new = _gru_cell(x_ref[...], h_carry[...], wx_ref[...], bx_ref[...],
                      wh_ref[...], bnh_ref[...])
    h_carry[...] = h_new
    h_seq_ref[...] = h_new.astype(h_seq_ref.dtype)

    # Classifier head only on the final step; its resident output block is written
    # back to HBM once, after the last grid iteration.
    @pl.when(t == pl.num_programs(0) - 1)
    def _head():
        y = jnp.dot(h_new, wc_ref[...], preferred_element_type=jnp.float32) + bc_ref[...]
        y_ref[...] = y.astype(y_ref.dtype)


def pack_params(params):
    """One-time packing (cache the result):
      - transpose the PyTorch (out, in) Linear weights,
      - give each gate its own 128-lane block (zero padded) so in-kernel slices are
        whole, lane-0-aligned vregs,
      - fold the z/r hidden biases into the x-path bias (b_nh stays separate because
        the reset gate multiplies it)."""
    pad = GATE_STRIDE - HIDDEN_SIZE

    def pad_w(w):   # torch (out=H, in) -> (in, GATE_STRIDE)
        return jnp.pad(w.T, ((0, 0), (0, pad)))

    def pad_b(b):   # (H,) -> (1, GATE_STRIDE)
        return jnp.pad(b.reshape(1, -1), ((0, 0), (0, pad)))

    wx = jnp.concatenate(
        [pad_w(params["wzx"]), pad_w(params["wrx"]), pad_w(params["wnx"])], axis=1)
    wh = jnp.concatenate(
        [pad_w(params["wzh"]), pad_w(params["wrh"]), pad_w(params["wnh"])], axis=1)
    bx = jnp.concatenate(
        [pad_b(params["bzx"] + params["bzh"]),
         pad_b(params["brx"] + params["brh"]),
         pad_b(params["bnx"])], axis=1)
    bnh = pad_b(params["bnh"])
    wc = params["wc"].T                 # (H, NUM_CLASSES)
    bc = params["bc"].reshape(1, -1)    # (1, NUM_CLASSES)
    return {"wx": wx, "bx": bx, "wh": wh, "bnh": bnh, "wc": wc, "bc": bc}


def my_model_forward_seq(xs, h0, packed):
    """Run T GRU steps + final classifier in ONE pallas_call.
    xs: (T, B, INPUT_SIZE), h0: (B, HIDDEN_SIZE), packed: pack_params(...).
    Returns (h_seq (T, B, HIDDEN_SIZE), logits (B, NUM_CLASSES)) where logits is the
    classifier applied to the last hidden state."""
    T, B, _ = xs.shape
    G3 = N_GATES * GATE_STRIDE
    resident = lambda t: (0, 0)   # same block every step -> stays in VMEM, no re-DMA
    return pl.pallas_call(
        gru_seq_kernel,
        out_shape=(
            jax.ShapeDtypeStruct((T, B, HIDDEN_SIZE), jnp.float32),
            jax.ShapeDtypeStruct((B, NUM_CLASSES), jnp.float32),
        ),
        grid=(T,),
        in_specs=[
            pl.BlockSpec((None, B, INPUT_SIZE), lambda t: (t, 0, 0)),   # x_t (per step)
            pl.BlockSpec((B, HIDDEN_SIZE), resident),                   # h0
            pl.BlockSpec((INPUT_SIZE, G3), resident),                   # wx (resident)
            pl.BlockSpec((1, G3), resident),                            # bx
            pl.BlockSpec((HIDDEN_SIZE, G3), resident),                  # wh (resident)
            pl.BlockSpec((1, GATE_STRIDE), resident),                   # bnh
            pl.BlockSpec((HIDDEN_SIZE, NUM_CLASSES), resident),         # wc (resident)
            pl.BlockSpec((1, NUM_CLASSES), resident),                   # bc
        ],
        out_specs=(
            pl.BlockSpec((None, B, HIDDEN_SIZE), lambda t: (t, 0, 0)),  # h_t (per step)
            pl.BlockSpec((B, NUM_CLASSES), resident),                   # logits (last step)
        ),
        scratch_shapes=[pltpu.VMEM((B, HIDDEN_SIZE), jnp.float32)],     # hidden carry
        compiler_params=pltpu.CompilerParams(
            dimension_semantics=("arbitrary",)),                        # sequential carry
    )(xs, h0, packed["wx"], packed["bx"], packed["wh"], packed["bnh"],
      packed["wc"], packed["bc"])
    # TODO(synk): for multi-sequence workloads, add a leading independent grid axis
    # marked "parallel" so both TensorCores on v7x are used.


def my_model_forward(x, hidden, packed):
    """Exact MyModel.forward semantics: one GRU step + classifier.
    x:(B,IN), hidden:(B,H) -> (new_hidden (B,H), logits (B,NUM_CLASSES)).
    Implemented as the T=1 case of the fused sequence kernel."""
    h_seq, y = my_model_forward_seq(x[None], hidden, packed)
    return h_seq[0], y


def init_params(key, input_size, hidden_size, num_classes):
    """Deterministic PyTorch-Linear-style init: U(-1/sqrt(fan_in), 1/sqrt(fan_in))."""
    specs = [
        ("wzx", input_size, (hidden_size, input_size)),
        ("bzx", input_size, (hidden_size,)),
        ("wzh", hidden_size, (hidden_size, hidden_size)),
        ("bzh", hidden_size, (hidden_size,)),
        ("wrx", input_size, (hidden_size, input_size)),
        ("brx", input_size, (hidden_size,)),
        ("wrh", hidden_size, (hidden_size, hidden_size)),
        ("brh", hidden_size, (hidden_size,)),
        ("wnx", input_size, (hidden_size, input_size)),
        ("bnx", input_size, (hidden_size,)),
        ("wnh", hidden_size, (hidden_size, hidden_size)),
        ("bnh", hidden_size, (hidden_size,)),
        ("wc", hidden_size, (num_classes, hidden_size)),
        ("bc", hidden_size, (num_classes,)),
    ]
    params = {}
    keys = jax.random.split(key, len(specs))
    for (name, fan_in, shape), k in zip(specs, keys):
        bound = 1.0 / jnp.sqrt(float(fan_in))
        params[name] = jax.random.uniform(
            k, shape, dtype=jnp.float32, minval=-bound, maxval=bound
        )
    return params


def model_reference(x, hidden, params):
    """Pure-JAX reference reproducing MyModel.forward exactly (full-f32 matmuls)."""
    hp = jax.lax.Precision.HIGHEST

    def lin(v, w, b):
        return jnp.dot(v, w.T, precision=hp) + b

    z = jax.nn.sigmoid(
        lin(x, params["wzx"], params["bzx"]) + lin(hidden, params["wzh"], params["bzh"]))
    r = jax.nn.sigmoid(
        lin(x, params["wrx"], params["brx"]) + lin(hidden, params["wrh"], params["brh"]))
    n = jnp.tanh(
        lin(x, params["wnx"], params["bnx"]) + r * lin(hidden, params["wnh"], params["bnh"]))
    h_new = z * hidden + (1.0 - z) * n
    y = lin(h_new, params["wc"], params["bc"])
    return h_new, y


def model_reference_seq(xs, h0, params):
    h, y = h0, None
    hs = []
    for t in range(xs.shape[0]):
        h, y = model_reference(xs[t], h, params)
        hs.append(h)
    return jnp.stack(hs), y


if __name__ == "__main__":
    key = jax.random.PRNGKey(0)
    k_params, k_x, k_h, k_seq = jax.random.split(key, 4)

    B = 8    # full sublane occupancy (8 f32 rows per vreg)
    T = 12   # demo sequence length
    params = init_params(k_params, INPUT_SIZE, HIDDEN_SIZE, NUM_CLASSES)
    packed = pack_params(params)   # packed once, cached / reused across calls

    x = jax.random.normal(k_x, (B, INPUT_SIZE), dtype=jnp.float32)
    hidden = jax.random.normal(k_h, (B, HIDDEN_SIZE), dtype=jnp.float32)
    xs = jax.random.normal(k_seq, (T, B, INPUT_SIZE), dtype=jnp.float32)

    # 1) Single step: exact MyModel.forward semantics.
    step_fn = jax.jit(my_model_forward)
    h_out, y_out = step_fn(x, hidden, packed)
    jax.block_until_ready((h_out, y_out))
    h_ref, y_ref = model_reference(x, hidden, params)
    assert h_out.shape == (B, HIDDEN_SIZE) and y_out.shape == (B, NUM_CLASSES)
    assert jnp.allclose(h_out, h_ref, atol=1e-5, rtol=1e-5), "hidden mismatch vs reference"
    assert jnp.allclose(y_out, y_ref, atol=1e-5, rtol=1e-5), "output mismatch vs reference"

    # 2) Sequence: T GRU steps fused into one pallas_call (launch overhead amortized,
    #    weights VMEM-resident, classifier only on the last step).
    seq_fn = jax.jit(my_model_forward_seq)
    h_seq, y_last = seq_fn(xs, hidden, packed)
    jax.block_until_ready((h_seq, y_last))
    h_seq_ref, y_last_ref = model_reference_seq(xs, hidden, params)
    assert h_seq.shape == (T, B, HIDDEN_SIZE) and y_last.shape == (B, NUM_CLASSES)
    assert jnp.allclose(h_seq, h_seq_ref, atol=1e-4, rtol=1e-4), "sequence hidden mismatch"
    assert jnp.allclose(y_last, y_last_ref, atol=1e-4, rtol=1e-4), "sequence output mismatch"

    print("KERNEL_OK")
</pallas_src>

<mosaic_0001>
module attributes {stable_mosaic.version = 11 : i64} {
  func.func @gru_seq_kernel(%arg0: i32, %arg1: memref<1x8x16xf32, #tpu.memory_space<vmem>>, %arg2: memref<8x16xf32, #tpu.memory_space<vmem>>, %arg3: memref<16x384xf32, #tpu.memory_space<vmem>>, %arg4: memref<1x384xf32, #tpu.memory_space<vmem>>, %arg5: memref<16x384xf32, #tpu.memory_space<vmem>>, %arg6: memref<1x128xf32, #tpu.memory_space<vmem>>, %arg7: memref<16x2xf32, #tpu.memory_space<vmem>>, %arg8: memref<1x2xf32, #tpu.memory_space<vmem>>, %arg9: memref<1x8x16xf32, #tpu.memory_space<vmem>>, %arg10: memref<8x2xf32, #tpu.memory_space<vmem>>, %arg11: memref<8x16xf32, #tpu.memory_space<vmem>>) attributes {dimension_semantics = [#tpu.dimension_semantics<arbitrary>], iteration_bounds = array<i64: 1>, scalar_prefetch = 0 : i64, scratch_operands = 1 : i64, tpu.core_type = #tpu.core_type<tc>, window_params = [{transform_indices = @transform_0, window_bounds = array<i64: 1, 8, 16>}, {pipeline_mode = #tpu.pipeline_mode<synchronous>, transform_indices = @transform_1, window_bounds = array<i64: 8, 16>}, {pipeline_mode = #tpu.pipeline_mode<synchronous>, transform_indices = @transform_2, window_bounds = array<i64: 16, 384>}, {pipeline_mode = #tpu.pipeline_mode<synchronous>, transform_indices = @transform_3, window_bounds = array<i64: 1, 384>}, {pipeline_mode = #tpu.pipeline_mode<synchronous>, transform_indices = @transform_4, window_bounds = array<i64: 16, 384>}, {pipeline_mode = #tpu.pipeline_mode<synchronous>, transform_indices = @transform_5, window_bounds = array<i64: 1, 128>}, {pipeline_mode = #tpu.pipeline_mode<synchronous>, transform_indices = @transform_6, window_bounds = array<i64: 16, 2>}, {pipeline_mode = #tpu.pipeline_mode<synchronous>, transform_indices = @transform_7, window_bounds = array<i64: 1, 2>}, {transform_indices = @transform_8, window_bounds = array<i64: 1, 8, 16>}, {pipeline_mode = #tpu.pipeline_mode<synchronous>, transform_indices = @transform_9, window_bounds = array<i64: 8, 2>}]} {
    %c0_i32 = arith.constant 0 : i32
    %0 = arith.cmpi eq, %arg0, %c0_i32 : i32
    %1 = arith.extui %0 : i1 to i32
    %c0_i32_0 = arith.constant 0 : i32
    %2 = arith.cmpi ne, %1, %c0_i32_0 : i32
    scf.if %2 {
      %c0_24 = arith.constant 0 : index
      %c0_25 = arith.constant 0 : index
      %51 = vector.load %arg2[%c0_24, %c0_25] : memref<8x16xf32, #tpu.memory_space<vmem>>, vector<8x16xf32>
      %c0_26 = arith.constant 0 : index
      %c0_27 = arith.constant 0 : index
      %52 = vector.load %arg11[%c0_26, %c0_27] : memref<8x16xf32, #tpu.memory_space<vmem>>, vector<8x16xf32>
      tpu.vector_store %arg11[%c0_26, %c0_27], %51 {strides = array<i32>} : memref<8x16xf32, #tpu.memory_space<vmem>>, vector<8x16xf32>,
    } else {
    }
    %c0 = arith.constant 0 : index
    %c0_1 = arith.constant 0 : index
    %c0_2 = arith.constant 0 : index
    %3 = vector.load %arg1[%c0, %c0_1, %c0_2] : memref<1x8x16xf32, #tpu.memory_space<vmem>>, vector<1x8x16xf32>
    %4 = vector.shape_cast %3 : vector<1x8x16xf32> to vector<8x16xf32>
    %c0_3 = arith.constant 0 : index
    %c0_4 = arith.constant 0 : index
    %5 = vector.load %arg11[%c0_3, %c0_4] : memref<8x16xf32, #tpu.memory_space<vmem>>, vector<8x16xf32>
    %c0_5 = arith.constant 0 : index
    %c0_6 = arith.constant 0 : index
    %6 = vector.load %arg3[%c0_5, %c0_6] : memref<16x384xf32, #tpu.memory_space<vmem>>, vector<16x384xf32>
    %c0_7 = arith.constant 0 : index
    %c0_8 = arith.constant 0 : index
    %7 = vector.load %arg4[%c0_7, %c0_8] : memref<1x384xf32, #tpu.memory_space<vmem>>, vector<1x384xf32>
    %c0_9 = arith.constant 0 : index
    %c0_10 = arith.constant 0 : index
    %8 = vector.load %arg5[%c0_9, %c0_10] : memref<16x384xf32, #tpu.memory_space<vmem>>, vector<16x384xf32>
    %c0_11 = arith.constant 0 : index
    %c0_12 = arith.constant 0 : index
    %9 = vector.load %arg6[%c0_11, %c0_12] : memref<1x128xf32, #tpu.memory_space<vmem>>, vector<1x128xf32>
    %cst = arith.constant dense<0.000000e+00> : vector<8x384xf32>
    %10 = tpu.matmul %4, %6, %cst {dimension_numbers = #tpu.dot_dimension_numbers<[1], [0], [0], [1], [0, 0, 1, 1], [], []>} : vector<8x16xf32>, vector<16x384xf32>, vector<8x384xf32> -> vector<8x384xf32>
    %11 = vector.broadcast %7 : vector<1x384xf32> to vector<8x384xf32>
    %12 = arith.addf %10, %11 : vector<8x384xf32>
    %cst_13 = arith.constant dense<0.000000e+00> : vector<8x384xf32>
    %13 = tpu.matmul %5, %8, %cst_13 {dimension_numbers = #tpu.dot_dimension_numbers<[1], [0], [0], [1], [0, 0, 1, 1], [], []>} : vector<8x16xf32>, vector<16x384xf32>, vector<8x384xf32> -> vector<8x384xf32>
    %14 = vector.extract_strided_slice %12 {offsets = [0, 0], sizes = [8, 128], strides = [1, 1]} : vector<8x384xf32> to vector<8x128xf32>
    %15 = vector.extract_strided_slice %13 {offsets = [0, 0], sizes = [8, 128], strides = [1, 1]} : vector<8x384xf32> to vector<8x128xf32>
    %16 = arith.addf %14, %15 : vector<8x128xf32>
    %17 = arith.negf %16 : vector<8x128xf32>
    %18 = math.exp %17 : vector<8x128xf32>
    %cst_14 = arith.constant 1.000000e+00 : f32
    %19 = vector.broadcast %cst_14 : f32 to vector<8x128xf32>
    %20 = arith.addf %19, %18 : vector<8x128xf32>
    %21 = arith.divf %19, %20 : vector<8x128xf32>
    %22 = vector.extract_strided_slice %21 {offsets = [0, 0], sizes = [8, 16], strides = [1, 1]} : vector<8x128xf32> to vector<8x16xf32>
    %23 = vector.extract_strided_slice %12 {offsets = [0, 128], sizes = [8, 128], strides = [1, 1]} : vector<8x384xf32> to vector<8x128xf32>
    %24 = vector.extract_strided_slice %13 {offsets = [0, 128], sizes = [8, 128], strides = [1, 1]} : vector<8x384xf32> to vector<8x128xf32>
    %25 = arith.addf %23, %24 : vector<8x128xf32>
    %26 = arith.negf %25 : vector<8x128xf32>
    %27 = math.exp %26 : vector<8x128xf32>
    %cst_15 = arith.constant 1.000000e+00 : f32
    %28 = vector.broadcast %cst_15 : f32 to vector<8x128xf32>
    %29 = arith.addf %28, %27 : vector<8x128xf32>
    %30 = arith.divf %28, %29 : vector<8x128xf32>
    %31 = vector.extract_strided_slice %12 {offsets = [0, 256], sizes = [8, 128], strides = [1, 1]} : vector<8x384xf32> to vector<8x128xf32>
    %32 = vector.extract_strided_slice %13 {offsets = [0, 256], sizes = [8, 128], strides = [1, 1]} : vector<8x384xf32> to vector<8x128xf32>
    %33 = vector.broadcast %9 : vector<1x128xf32> to vector<8x128xf32>
    %34 = arith.addf %32, %33 : vector<8x128xf32>
    %35 = arith.mulf %30, %34 : vector<8x128xf32>
    %36 = arith.addf %31, %35 : vector<8x128xf32>
    %37 = math.tanh %36 : vector<8x128xf32>
    %38 = vector.extract_strided_slice %37 {offsets = [0, 0], sizes = [8, 16], strides = [1, 1]} : vector<8x128xf32> to vector<8x16xf32>
    %39 = arith.mulf %22, %5 : vector<8x16xf32>
    %cst_16 = arith.constant 1.000000e+00 : f32
    %40 = vector.broadcast %cst_16 : f32 to vector<8x16xf32>
    %41 = arith.subf %40, %22 : vector<8x16xf32>
    %42 = arith.mulf %41, %38 : vector<8x16xf32>
    %43 = arith.addf %39, %42 : vector<8x16xf32>
    %c0_17 = arith.constant 0 : index
    %c0_18 = arith.constant 0 : index
    %44 = vector.load %arg11[%c0_17, %c0_18] : memref<8x16xf32, #tpu.memory_space<vmem>>, vector<8x16xf32>
    tpu.vector_store %arg11[%c0_17, %c0_18], %43 {strides = array<i32>} : memref<8x16xf32, #tpu.memory_space<vmem>>, vector<8x16xf32>,
    %c0_19 = arith.constant 0 : index
    %c0_20 = arith.constant 0 : index
    %c0_21 = arith.constant 0 : index
    %45 = vector.load %arg9[%c0_19, %c0_20, %c0_21] : memref<1x8x16xf32, #tpu.memory_space<vmem>>, vector<1x8x16xf32>
    %46 = vector.shape_cast %45 : vector<1x8x16xf32> to vector<8x16xf32>
    %47 = vector.shape_cast %43 : vector<8x16xf32> to vector<1x8x16xf32>
    tpu.vector_store %arg9[%c0_19, %c0_20, %c0_21], %47 {strides = array<i32>} : memref<1x8x16xf32, #tpu.memory_space<vmem>>, vector<1x8x16xf32>,
    %c0_i32_22 = arith.constant 0 : i32
    %48 = arith.cmpi eq, %arg0, %c0_i32_22 : i32
    %49 = arith.extui %48 : i1 to i32
    %c0_i32_23 = arith.constant 0 : i32
    %50 = arith.cmpi ne, %49, %c0_i32_23 : i32
    scf.if %50 {
      %c0_24 = arith.constant 0 : index
      %c0_25 = arith.constant 0 : index
      %51 = vector.load %arg7[%c0_24, %c0_25] : memref<16x2xf32, #tpu.memory_space<vmem>>, vector<16x2xf32>
      %cst_26 = arith.constant dense<0.000000e+00> : vector<8x2xf32>
      %52 = tpu.matmul %43, %51, %cst_26 {dimension_numbers = #tpu.dot_dimension_numbers<[1], [0], [0], [1], [0, 0, 1, 1], [], []>} : vector<8x16xf32>, vector<16x2xf32>, vector<8x2xf32> -> vector<8x2xf32>
      %c0_27 = arith.constant 0 : index
      %c0_28 = arith.constant 0 : index
      %53 = vector.load %arg8[%c0_27, %c0_28] : memref<1x2xf32, #tpu.memory_space<vmem>>, vector<1x2xf32>
      %54 = vector.broadcast %53 : vector<1x2xf32> to vector<8x2xf32>
      %55 = arith.addf %52, %54 : vector<8x2xf32>
      %c0_29 = arith.constant 0 : index
      %c0_30 = arith.constant 0 : index
      %56 = vector.load %arg10[%c0_29, %c0_30] : memref<8x2xf32, #tpu.memory_space<vmem>>, vector<8x2xf32>
      tpu.vector_store %arg10[%c0_29, %c0_30], %55 {strides = array<i32>} : memref<8x2xf32, #tpu.memory_space<vmem>>, vector<8x2xf32>,
    } else {
    }
    return
  }
  func.func @transform_0(%arg0: i32) -> (i32, i32, i32) {
    %c0_i32 = arith.constant 0 : i32
    %c0_i32_0 = arith.constant 0 : i32
    %c0_i32_1 = arith.constant 0 : i32
    return %arg0, %c0_i32, %c0_i32_0 : i32, i32, i32
  }
  func.func @transform_1(%arg0: i32) -> (i32, i32) {
    %c0_i32 = arith.constant 0 : i32
    %c0_i32_0 = arith.constant 0 : i32
    %c0_i32_1 = arith.constant 0 : i32
    return %c0_i32, %c0_i32_0 : i32, i32
  }
  func.func @transform_2(%arg0: i32) -> (i32, i32) {
    %c0_i32 = arith.constant 0 : i32
    %c0_i32_0 = arith.constant 0 : i32
    %c0_i32_1 = arith.constant 0 : i32
    return %c0_i32, %c0_i32_0 : i32, i32
  }
  func.func @transform_3(%arg0: i32) -> (i32, i32) {
    %c0_i32 = arith.constant 0 : i32
    %c0_i32_0 = arith.constant 0 : i32
    %c0_i32_1 = arith.constant 0 : i32
    return %c0_i32, %c0_i32_0 : i32, i32
  }
  func.func @transform_4(%arg0: i32) -> (i32, i32) {
    %c0_i32 = arith.constant 0 : i32
    %c0_i32_0 = arith.constant 0 : i32
    %c0_i32_1 = arith.constant 0 : i32
    return %c0_i32, %c0_i32_0 : i32, i32
  }
  func.func @transform_5(%arg0: i32) -> (i32, i32) {
    %c0_i32 = arith.constant 0 : i32
    %c0_i32_0 = arith.constant 0 : i32
    %c0_i32_1 = arith.constant 0 : i32
    return %c0_i32, %c0_i32_0 : i32, i32
  }
  func.func @transform_6(%arg0: i32) -> (i32, i32) {
    %c0_i32 = arith.constant 0 : i32
    %c0_i32_0 = arith.constant 0 : i32
    %c0_i32_1 = arith.constant 0 : i32
    return %c0_i32, %c0_i32_0 : i32, i32
  }
  func.func @transform_7(%arg0: i32) -> (i32, i32) {
    %c0_i32 = arith.constant 0 : i32
    %c0_i32_0 = arith.constant 0 : i32
    %c0_i32_1 = arith.constant 0 : i32
    return %c0_i32, %c0_i32_0 : i32, i32
  }
  func.func @transform_8(%arg0: i32) -> (i32, i32, i32) {
    %c0_i32 = arith.constant 0 : i32
    %c0_i32_0 = arith.constant 0 : i32
    %c0_i32_1 = arith.constant 0 : i32
    return %arg0, %c0_i32, %c0_i32_0 : i32, i32, i32
  }
  func.func @transform_9(%arg0: i32) -> (i32, i32) {
    %c0_i32 = arith.constant 0 : i32
    %c0_i32_0 = arith.constant 0 : i32
    %c0_i32_1 = arith.constant 0 : i32
    return %c0_i32, %c0_i32_0 : i32, i32
  }
}

</mosaic_0001>

<bundles_post_ra>
// kernel: my_model_forward.1
= control target key start
LH: loop header
LB: loop body
LE: loop exit
PB: predicated region body
PF: predicated region fallthrough
CT: control target
= control target key end

     0   :  { %15 = vsyncpa [#allocation4], 0  ;;  %s1008_s0 = inlined_call_operand.hbm [shape: f32[1,8,16], index: 0, kind: input, shape index: {}]   ;;  %s1009_s1 = inlined_call_operand.hbm [shape: f32[8,16], index: 1, kind: input, shape index: {}]   ;;  %s1010_s2 = inlined_call_operand.vmem [shape: f32[16,384], index: 2, kind: input, shape index: {}]   ;;  %s1011_s3 = inlined_call_operand.hbm [shape: f32[1,384], index: 3, kind: input, shape index: {}]   ;;  %s1012_s4 = inlined_call_operand.hbm [shape: f32[16,384], index: 4, kind: input, shape index: {}]   ;;  %s1013_s5 = inlined_call_operand.hbm [shape: f32[1,128], index: 5, kind: input, shape index: {}]   ;;  %s1014_s6 = inlined_call_operand.vmem [shape: f32[16,2], index: 6, kind: input, shape index: {}]   ;;  %s1015_s7 = inlined_call_operand.hbm [shape: f32[1,2], index: 7, kind: input, shape index: {}]   ;;  %s1016_s8 = inlined_call_operand.hbm [shape: f32[1,8,16], index: 8, kind: output, shape index: {0}]   ;;  %s1017_s9 = inlined_call_operand.vmem [shape: f32[8,2], index: 9, kind: output, shape index: {1}]  }
   0x1   :  { %16 = vsyncpa [#allocation7], 0 }
   0x2   :  { %17 = vsyncpa [#allocation10], 0 }
   0x3   :  { %18 = vsyncpa [#allocation13], 0 }
   0x4   :  { %19 = vsyncpa [#allocation5], 0  ;;  %s817_s30 = smov [#allocation6]   ;;  %s818_s11 = smov [#allocation9]  }
   0x5   :  { %s36_s10 = sshll.u32 %s817_s30, 4  ;;  %s57_s12 = sshll.u32 %s818_s11, 4  ;;  %s37_s10 = int_to_ptr.vmem [resolvable:$true] %s36_s10  ;;  %s879_s12 = int_to_ptr.vmem [resolvable:$true] %s57_s12 }
   0x6   :  { %s653_s15 = scalar_lea.hbm %s1009_s1, 128 }
   0x7   :  { %p654_p0 = scmp.ne.s32.totalorder %s1009_s1, %s653_s15  ;;  %p657_p1 = scmp.lt.u32.totalorder %s653_s15, %s1009_s1 }
   0x9   :  { %p659_p2 = pnand %p657_p1, %p654_p0 }
   0xb   :  { %662 = shalt.err (!%p659_p2)
}
   0xc   :  { %s663_s20 = scalar_lea.vmem %s37_s10, 128  ;;  %p668_p4 = scmp.lt.s32.totalorder %s37_s10, %s37_s10 }
   0xd   :  { %p664_p3 = scmp.ne.s32.totalorder %s37_s10, %s663_s20  ;;  %p669_p5 = scmp.lt.s32.totalorder %s663_s20, %s663_s20 }
   0xf   :  { %p670_p6 = por %p669_p5, %p668_p4 }
  0x11   :  { %p671_p7 = pnand %p670_p6, %p664_p3 }
  0x13   :  { %674 = shalt.err (!%p671_p7)
}
  0x14   :  { %39 = dma.hbm_to_vmem [thread:$0]  %s1009_s1, 128, %s37_s10, [#allocation7]  }
  0x15   :  { %s675_s25 = scalar_lea.hbm %s1012_s4, 768 }
  0x16   :  { %p676_p8 = scmp.ne.s32.totalorder %s1012_s4, %s675_s25  ;;  %p679_p9 = scmp.lt.u32.totalorder %s675_s25, %s1012_s4 }
  0x18   :  { %p681_p10 = pnand %p679_p9, %p676_p8 }
  0x1a   :  { %684 = shalt.err (!%p681_p10)
}
  0x1b   :  { %s685_s30 = scalar_lea.vmem %s879_s12, 768  ;;  %p690_p12 = scmp.lt.s32.totalorder %s879_s12, %s879_s12 }
  0x1c   :  { %p686_p11 = scmp.ne.s32.totalorder %s879_s12, %s685_s30  ;;  %p691_p13 = scmp.lt.s32.totalorder %s685_s30, %s685_s30 }
  0x1e   :  { %p692_p0 = por %p691_p13, %p690_p12 }
  0x20   :  { %p693_p1 = pnand %p692_p0, %p686_p11 }
  0x22   :  { %696 = shalt.err (!%p693_p1)
}
  0x23   :  { %s819_s1 = smov 384   ;;  %s820_s10 = smov 24  }
  0x24   :  { %63 = dma.hbm_to_vmem [thread:$0]  %s1012_s4, 768, %s879_s12, [#allocation10], %s819_s1, %s819_s1, %s820_s10  }
  0x25   :  { %s821_s14 = smov [#allocation3]   ;;  %s822_s16 = smov [#allocation8]  }
  0x26   :  { %s26_s15 = sshll.u32 %s821_s14, 4  ;;  %s48_s17 = sshll.u32 %s822_s16, 4  ;;  %s27_s15 = int_to_ptr.vmem [resolvable:$true] %s26_s15  ;;  %s49_s17 = int_to_ptr.vmem [resolvable:$true] %s48_s17 }
  0x27   :  { %s697_s20 = scalar_lea.hbm %s1008_s0, 128 }
  0x28   :  { %p698_p2 = scmp.ne.s32.totalorder %s1008_s0, %s697_s20  ;;  %p701_p3 = scmp.lt.u32.totalorder %s697_s20, %s1008_s0 }
  0x2a   :  { %p703_p4 = pnand %p701_p3, %p698_p2 }
  0x2c   :  { %706 = shalt.err (!%p703_p4)
}
  0x2d   :  { %s707_s4 = scalar_lea.vmem %s27_s15, 128  ;;  %p712_p6 = scmp.lt.s32.totalorder %s27_s15, %s27_s15 }
  0x2e   :  { %p708_p5 = scmp.ne.s32.totalorder %s27_s15, %s707_s4  ;;  %p713_p7 = scmp.lt.s32.totalorder %s707_s4, %s707_s4 }
  0x30   :  { %p714_p8 = por %p713_p7, %p712_p6 }
  0x32   :  { %p715_p9 = pnand %p714_p8, %p708_p5 }
  0x34   :  { %718 = shalt.err (!%p715_p9)
}
  0x35   :  { %29 = dma.hbm_to_vmem [thread:$0]  %s1008_s0, 128, %s27_s15, [#allocation4]  }
  0x36   :  { %s719_s28 = scalar_lea.hbm %s1011_s3, 48 }
  0x37   :  { %p720_p10 = scmp.ne.s32.totalorder %s1011_s3, %s719_s28  ;;  %p723_p11 = scmp.lt.u32.totalorder %s719_s28, %s1011_s3 }
  0x39   :  { %p725_p12 = pnand %p723_p11, %p720_p10 }
  0x3b   :  { %728 = shalt.err (!%p725_p12)
}
  0x3c   :  { %s729_s11 = scalar_lea.vmem %s49_s17, 48  ;;  %s733_s13 = scalar_lea.vmem %s49_s17, 64 }
  0x3d   :  { %p730_p13 = scmp.ne.s32.totalorder %s49_s17, %s729_s11  ;;  %p734_p0 = scmp.lt.s32.totalorder %s49_s17, %s49_s17 }
  0x3e   :  { %p735_p1 = scmp.lt.s32.totalorder %s733_s13, %s729_s11 }
  0x40   :  { %p736_p2 = por %p735_p1, %p734_p0 }
  0x42   :  { %p737_p3 = pnand %p736_p2, %p730_p13 }
  0x44   :  { %740 = shalt.err (!%p737_p3)
}
  0x45   :  { %51 = dma.hbm_to_vmem [thread:$0]  %s1011_s3, 48, %s49_s17, [#allocation7]  }
  0x46   :  { %s823_s15 = smov [#allocation11]   ;;  %s824_s18 = smov [#allocation12]  }
  0x47   :  { %s70_s16 = sshll.u32 %s823_s15, 4  ;;  %s82_s19 = sshll.u32 %s824_s18, 4  ;;  %s71_s16 = int_to_ptr.vmem [resolvable:$true] %s70_s16  ;;  %s83_s19 = int_to_ptr.vmem [resolvable:$true] %s82_s19 }
  0x48   :  { %s741_s22 = scalar_lea.hbm %s1013_s5, 16 }
  0x49   :  { %p742_p4 = scmp.ne.s32.totalorder %s1013_s5, %s741_s22  ;;  %p745_p5 = scmp.lt.u32.totalorder %s741_s22, %s1013_s5 }
  0x4b   :  { %p747_p6 = pnand %p745_p5, %p742_p4 }
  0x4d   :  { %750 = shalt.err (!%p747_p6)
}
  0x4e   :  { %s751_s3 = scalar_lea.vmem %s71_s16, 16  ;;  %s755_s17 = scalar_lea.vmem %s71_s16, 32 }
  0x4f   :  { %p752_p7 = scmp.ne.s32.totalorder %s71_s16, %s751_s3  ;;  %p756_p8 = scmp.lt.s32.totalorder %s71_s16, %s71_s16 }
  0x50   :  { %p757_p9 = scmp.lt.s32.totalorder %s755_s17, %s751_s3 }
  0x52   :  { %p758_p10 = por %p757_p9, %p756_p8 }
  0x54   :  { %p759_p11 = pnand %p758_p10, %p752_p7 }
  0x56   :  { %762 = shalt.err (!%p759_p11)
}
  0x57   :  { %73 = dma.hbm_to_vmem [thread:$0]  %s1013_s5, 16, %s71_s16, [#allocation10]  }
  0x58   :  { %s763_s29 = scalar_lea.hbm %s1015_s7, 16 }
  0x59   :  { %p764_p12 = scmp.ne.s32.totalorder %s1015_s7, %s763_s29  ;;  %p767_p13 = scmp.lt.u32.totalorder %s763_s29, %s1015_s7 }
  0x5b   :  { %p769_p0 = pnand %p767_p13, %p764_p12 }
  0x5d   :  { %772 = shalt.err (!%p769_p0)
}
  0x5e   :  { %s773_s13 = scalar_lea.vmem %s83_s19, 16  ;;  %s777_s0 = scalar_lea.vmem %s83_s19, 32 }
  0x5f   :  { %p774_p1 = scmp.ne.s32.totalorder %s83_s19, %s773_s13  ;;  %p778_p2 = scmp.lt.s32.totalorder %s83_s19, %s83_s19 }
  0x60   :  { %p779_p3 = scmp.lt.s32.totalorder %s777_s0, %s773_s13 }
  0x62   :  { %p780_p4 = por %p779_p3, %p778_p2 }
  0x64   :  { %p781_p5 = pnand %p780_p4, %p774_p1 }
  0x66   :  { %784 = shalt.err (!%p781_p5)
}
  0x67   :  { %85 = dma.hbm_to_vmem [thread:$0]  %s1015_s7, 16, %s83_s19, [#allocation13]  }
  0x68   :  { %807 = dma.done.wait [#allocation4], 128  }
  0x69   :  { %808 = vsyncadd [#allocation4], 4294967168 }
  0x6a   :  { %809 = dma.done.wait [#allocation7], 176  }
  0x6b   :  { %810 = vsyncadd [#allocation7], 4294967120 }
  0x6c   :  { %811 = dma.done.wait [#allocation10], 784  }
  0x6d   :  { %812 = vsyncadd [#allocation10], 4294966512 }
  0x6e   :  { %813 = dma.done.wait [#allocation13], 16  }
  0x6f   :  { %814 = vsyncadd [#allocation13], 4294967280  ;;  %v825_v0 = vmov 0.0   ;;  %v826_v1 = vmov 0.0|0.0   ;;  %vm827_vm0 = vmmov 0   ;;  %vm109_vm1 = vcmask 130048  }
  0x70   :  { %211 = vmatprep.mubr.f32.mxu0 %v825_v0  ;;  %614 = vmatprep.subr.bf16.mxu1 %v826_v1  ;;  %v114_v2 = vld [vmem:[%s1010_s2 + $0x8] sm:$0xff]  ;;  %v117_v3 = vld [vmem:[%s1010_s2 + $0x20] sm:$0xff]  ;;  %v116_v6 = vld [vmem:[%s1010_s2 + $0x18] sm:$0xff]  ;;  %v128_v26 = vlaneseq }
  0x71   :  { %593 = vmatprep.mubr.msk.f32.mxu1 %vm827_vm0, %v825_v0  ;;  %v113_v4 = vld [vmem:[%s1010_s2] sm:$0xff]  ;;  %v610_v5 = vpack.c.bf16 %v117_v3, %v114_v2  ;;  %v108_v7 = vld [vmem:[#allocation6] sm:$0xff]  ;;  %v118_v15 = vld [vmem:[%s1010_s2 + $0x28] sm:$0xff] }
  0x72   :  { %v612_v8 = vpack.c.bf16 %v116_v6, %v113_v4  ;;  %110 = vst.msk [vmem:[#allocation2] sm:$0xff] %vm109_vm1, %v108_v7  ;;  %v121_v9 = vld [vmem:[#allocation9 + $0x8] sm:$0xff]  ;;  %v124_v10 = vld [vmem:[#allocation9 + $0x20] sm:$0xff]  ;;  %v123_v13 = vld [vmem:[#allocation9 + $0x18] sm:$0xff]  ;;  %v129_v27 = vshrl.u32 %v128_v26, 7 }
  0x73   :  { %v120_v11 = vld [vmem:[#allocation9] sm:$0xff]  ;;  %611 = vmatprep.subr.bf16.mxu0 %v610_v5  ;;  %v617_v12 = vpack.c.bf16 %v124_v10, %v121_v9  ;;  %v115_v14 = vld [vmem:[%s1010_s2 + $0x10] sm:$0xff]  ;;  %v111_v16 = vld [vmem:[#allocation3] sm:$0xff] }
  0x74   :  { %613 = vmatpush1.bf16.msra.mxu0 %v612_v8  ;;  %v619_v17 = vpack.c.bf16 %v123_v13, %v120_v11  ;;  %v615_v18 = vpack.c.bf16 %v118_v15, %v115_v14  ;;  %v122_v19 = vld [vmem:[#allocation9 + $0x10] sm:$0xff]  ;;  %v125_v20 = vld [vmem:[#allocation9 + $0x28] sm:$0xff]  ;;  %v134_v28 = vsub.s32 1, %v129_v27  ;;  %v119_v30 = vld [vmem:[#allocation8] sm:$0x7]  ;;  %v130_v32 = vsub.s32 0, %v129_v27 }
  0x75   :  { %618 = vmatprep.subr.bf16.mxu0 %v617_v12  ;;  %v622_v21 = vpack.c.bf16 %v125_v20, %v122_v19  ;;  %v465_v23 = vld [vmem:[%s1014_s6] sm:$0xff]  ;;  %v466_v24 = vld [vmem:[%s1014_s6 + $0x8] sm:$0xff]  ;;  %v138_v45 = vsub.s32 2, %v129_v27  ;;  %s828_s6 = smov [#allocation14]  }
  0x76   :  { %616 = vmatpush3.bf16.msra.mxu1 %v615_v18  ;;  %v625_v25 = vpack.c.bf16 %v466_v24, %v465_v23  ;;  %v135_v33 = vrot.slane %v119_v30, %v134_v28  ;;  %v131_v37 = vrot.slane %v119_v30, %v130_v32  ;;  %v577_v47 = vld [vmem:[#allocation11] ss:$0 sm:$0xff]  ;;  %s555_s26 = sshll.u32 %s828_s6, 4  ;;  %s556_s26 = int_to_ptr.vmem [resolvable:$true] %s555_s26 }
  0x77   :  { %571 = vmatmul.mubr.msk.f32.vlgmr.msra.gmra.mrb[0].mxu0 %vm109_vm1, %v111_v16  ;;  %621 = vmatprep.subr.bf16.mxu1 %v826_v1  ;;  %v139_v49 = vrot.slane %v119_v30, %v138_v45  ;;  %s785_s27 = scalar_lea.vmem %s556_s26, 128  ;;  %p790_p7 = scmp.lt.s32.totalorder %s556_s26, %s556_s26 }
  0x78   :  { %620 = vmatpush1.bf16.msra.mxu0 %v619_v17  ;;  %355 = vmatprep.mubr.f32.mxu0 %v825_v0  ;;  %p786_p6 = scmp.ne.s32.totalorder %s556_s26, %s785_s27  ;;  %p791_p8 = scmp.lt.s32.totalorder %s785_s27, %s785_s27 }
  0x79   :  { %594 = vmatmul.mubr.msk.f32.vlgmr.msra.gmra.mrb[0].mxu1 %vm109_vm1, %v111_v16  ;;  %624 = vmatprep.subr.bf16.mxu0 %v826_v1  ;;  %v112_v22 = vld [vmem:[#allocation2] sm:$0xff] }
  0x7a   :  { %623 = vmatpush3.bf16.msra.mxu1 %v622_v21  ;;  %600 = vmatprep.mubr.msk.f32.mxu1 %vm827_vm0, %v825_v0  ;;  %p792_p9 = por %p791_p8, %p790_p7 }
  0x7c   :  { %p793_p10 = pnand %p792_p9, %p786_p6 }
  0x7d   :  { %601 = vmatmul.mubr.msk.f32.vlgmr.msra.gmra.mrb[2].mxu1 %vm109_vm1, %v112_v22 }
  0x7f   :  { %573 = vmatmul.mubr.msk.f32.vlgmr.msra.gmra.mrb[0].mxu0 %vm109_vm1, %v112_v22 }
  0x80   :  { %607 = vmatprep.mubr.msk.f32.mxu0 %vm827_vm0, %v825_v0  ;;  %626 = vmatpush3.bf16.msra.mxu0 %v625_v25 }
 0x14c   :  { %v284_v29 = vpop.f32.mrb[0].mxu1 }
 0x14d   :  { %v595_v31 = vpop.f32.mrb[1].mxu1  ;;  %v285_v52 = vadd.f32 %v284_v29, %v139_v49 }
 0x150   :  { %v428_v34 = vpop.f32.mrb[2].mxu1 }
 0x151   :  { %v602_v35 = vpop.f32.mrb[3].mxu1  ;;  %v452_v50 = vadd.f32 %v577_v47, %v428_v34 }
 0x152   :  { %v357_v36 = vpop.f32.mrb[0].mxu0 }
 0x153   :  { %v359_v38 = vpop.f32.mrb[1].mxu0  ;;  %v627_v41 = vadd.f32 %v357_v36, %v131_v37 }
 0x154   :  { %v628_v39 = vadd.f32 %v359_v38, %v135_v33 }
 0x155   :  { %v575_v42 = vmul.f32 -1.442695, %v627_v41 }
 0x156   :  { %v576_v40 = vmul.f32 -1.442695, %v628_v39 }
 0x158   :  { %643 = vpow2.f32 %v576_v40 }
 0x159   :  { %645 = vpow2.f32 %v575_v42 }
 0x162   :  { %v644_v43 = vpop.eup %643 }
 0x163   :  { %v443_v44 = vadd.f32 1.0, %v644_v43  ;;  %v646_v46 = vpop.eup %645 }
 0x164   :  { %v436_v48 = vadd.f32 1.0, %v646_v46 }
 0x165   :  { %647 = vrcp.f32 %v443_v44 }
 0x166   :  { %649 = vrcp.f32 %v436_v48 }
 0x16f   :  { %v648_v51 = vpop.eup %647 }
 0x170   :  { %v453_v53 = vmul.f32 %v648_v51, %v452_v50  ;;  %v650_v55 = vpop.eup %649 }
 0x171   :  { %v457_v56 = vsub.f32 1.0, %v650_v55  ;;  %v456_v58 = vmul.f32 %v650_v55, %v112_v22 }
 0x172   :  { %v454_v54 = vadd.f32 %v453_v53, %v285_v52 }
 0x174   :  { %651 = vtanh.f32 %v454_v54 }
 0x17e   :  { %v652_v57 = vpop.eup %651 }
 0x17f   :  { %v458_v59 = vmul.f32 %v652_v57, %v457_v56 }
 0x181   :  { %v459_v60 = vadd.f32 %v458_v59, %v456_v58 }
 0x183   :  { %460 = vst.msk [vmem:[#allocation2] sm:$0xff] %vm109_vm1, %v459_v60  ;;  %608 = vmatmul.mubr.msk.f32.vlgmr.msra.gmra.mrb[2].mxu0 %vm109_vm1, %v459_v60  ;;  %461 = vst.msk [vmem:[#allocation14] sm:$0xff] %vm109_vm1, %v459_v60 }
 0x184   :  { %796 = shalt.err (!%p793_p10)
}
 0x185   :  { %s797_s30 = scalar_lea.hbm %s1016_s8, 128 }
 0x186   :  { %p798_p11 = scmp.ne.s32.totalorder %s1016_s8, %s797_s30  ;;  %p801_p12 = scmp.lt.u32.totalorder %s797_s30, %s1016_s8 }
 0x188   :  { %p803_p13 = pnand %p801_p12, %p798_p11 }
 0x18a   :  { %806 = shalt.err (!%p803_p13)
}
 0x18b   :  { %558 = dma.vmem_to_hbm [thread:$0]  %s556_s26, 128, %s1016_s8, [#allocation5]   ;;  %v578_v61 = vld [vmem:[#allocation12] ss:$0 sm:$0xff]  ;;  %vm547_vm2 = vcmask 15360  }
 0x256   :  { %v543_v62 = vpop.f32.mrb[2].mxu0 }
 0x257   :  { %v544_v63 = vadd.f32 %v578_v61, %v543_v62  ;;  %v609_v0 = vpop.f32.mrb[3].mxu0 }
 0x259   :  { %548 = vst.msk [vmem:[%s1017_s9] sm:$0xff] %vm547_vm2, %v544_v63 }
 0x25a   :  { %815 = dma.done.wait [#allocation5], 128  }
 0x25b   :  { %816 = vsyncadd [#allocation5], 4294967168 }
 0x25c   :  { %566 = vsyncpa [#allocation4], 1 }
 0x25d   :  { %567 = vsyncpa [#allocation7], 1 }
 0x25e   :  { %568 = vsyncpa [#allocation10], 1 }
 0x25f   :  { %569 = vsyncpa [#allocation13], 1 }
 0x260   :  { %570 = vsyncpa [#allocation5], 1 }

</bundles_post_ra>
